<compile_context>
chip_gen: v7x
topology: tpu7x:2x2x1
jax: 0.10.0
libtpu: 0.0.40
codegen_flags: <defaults>
</compile_context>

<pallas_src>
import functools

import jax
import jax.numpy as jnp
from jax.experimental import pallas as pl
from jax.experimental.pallas import tpu as pltpu


def _round_up(x: int, m: int) -> int:
    return ((x + m - 1) // m) * m


def mlp_kernel(x_ref, w1t_ref, b1_ref, w2t_ref, b2_ref, w3t_ref, b3_ref, o_ref):
    """One batch tile: [TB, K1] -> [TB, OP].  Everything resident in VMEM."""
    cdt = x_ref.dtype  # compute dtype for MXU inputs (f32 by default, bf16 optional)

    x = x_ref[...]                                                        # [TB, K1]

    h1 = jnp.dot(x, w1t_ref[...], preferred_element_type=jnp.float32)    # [TB, H1] f32 acc
    h1 = h1 + b1_ref[...]                                                 # bias [1, H1] broadcast
    h1 = jnp.maximum(h1, 0.0).astype(cdt)                                 # ReLU on VPU

    h2 = jnp.dot(h1, w2t_ref[...], preferred_element_type=jnp.float32)   # [TB, H2]
    h2 = h2 + b2_ref[...]
    h2 = jnp.maximum(h2, 0.0).astype(cdt)

    out = jnp.dot(h2, w3t_ref[...], preferred_element_type=jnp.float32)  # [TB, OP]
    out = out + b3_ref[...]

    o_ref[...] = out.astype(o_ref.dtype)


@functools.partial(jax.jit, static_argnames=("tb_max", "compute_dtype"))
def net_forward(x_nchw, params, *, tb_max: int = 512, compute_dtype=jnp.float32):
    """Forward pass equivalent to Net.forward. x_nchw: [B, C, H, W] float32."""
    W1, b1, W2, b2, W3, b3 = params
    B = x_nchw.shape[0]
    x2d = x_nchw.reshape(B, -1).astype(jnp.float32)                      # [B, 784]

    in_f = x2d.shape[1]                     # 784
    H1 = W1.shape[0]                        # 256
    H2 = W2.shape[0]                        # 256
    O = W3.shape[0]                         # 10

    K1 = _round_up(in_f, 128)               # 896  (lane-aligned K of layer 1)
    OP = _round_up(max(O, 128), 128)        # 128  (lane-dense output stores)

    # Batch tile: multiple of 8 sublanes, capped so double-buffered activation
    # tiles + resident weights fit comfortably in scoped VMEM on all chips.
    TB = min(tb_max, _round_up(B, 8))
    Bp = _round_up(B, TB)

    # ---- wrapper-side layout prep (zero padding is exact: padded K rows are 0) ----
    x_pad = jnp.zeros((Bp, K1), compute_dtype).at[:B, :in_f].set(
        x2d.astype(compute_dtype))
    w1t = jnp.zeros((K1, H1), compute_dtype).at[:in_f, :].set(
        W1.T.astype(compute_dtype))                                      # [896, 256]
    w2t = W2.T.astype(compute_dtype)                                     # [256, 256]
    w3t = jnp.zeros((H2, OP), compute_dtype).at[:, :O].set(
        W3.T.astype(compute_dtype))                                      # [256, 128]
    b1r = b1.reshape(1, H1).astype(jnp.float32)
    b2r = b2.reshape(1, H2).astype(jnp.float32)
    b3r = jnp.zeros((1, OP), jnp.float32).at[:, :O].set(
        b3.reshape(1, O).astype(jnp.float32))

    grid = (Bp // TB,)

    out = pl.pallas_call(
        mlp_kernel,
        out_shape=jax.ShapeDtypeStruct((Bp, OP), jnp.float32),
        grid_spec=pltpu.PrefetchScalarGridSpec(
            num_scalar_prefetch=0,
            grid=grid,
            in_specs=[
                # activations: tiled along batch -> pipelined DMA
                pl.BlockSpec((TB, K1), lambda i: (i, 0)),
                # weights & biases: constant index_map -> resident across grid
                pl.BlockSpec((K1, H1), lambda i: (0, 0)),
                pl.BlockSpec((1, H1), lambda i: (0, 0)),
                pl.BlockSpec((H1, H2), lambda i: (0, 0)),
                pl.BlockSpec((1, H2), lambda i: (0, 0)),
                pl.BlockSpec((H2, OP), lambda i: (0, 0)),
                pl.BlockSpec((1, OP), lambda i: (0, 0)),
            ],
            out_specs=pl.BlockSpec((TB, OP), lambda i: (i, 0)),
        ),
        compiler_params=pltpu.CompilerParams(
            dimension_semantics=("parallel",),
        ),
    )(x_pad, w1t, b1r, w2t, b2r, w3t, b3r)

    return out[:B, :O]


def init_params(key):
    num_inputs, num_outputs, num_hiddens1, num_hiddens2 = 784, 10, 256, 256
    k1, k2, k3 = jax.random.split(key, 3)
    W1 = 0.01 * jax.random.normal(k1, (num_hiddens1, num_inputs), dtype=jnp.float32)
    b1 = jnp.zeros((num_hiddens1,), dtype=jnp.float32)
    W2 = 0.01 * jax.random.normal(k2, (num_hiddens2, num_hiddens1), dtype=jnp.float32)
    b2 = jnp.zeros((num_hiddens2,), dtype=jnp.float32)
    W3 = 0.01 * jax.random.normal(k3, (num_outputs, num_hiddens2), dtype=jnp.float32)
    b3 = jnp.zeros((num_outputs,), dtype=jnp.float32)
    return (W1, b1, W2, b2, W3, b3)


def reference_forward(x_nchw, params):
    """Pure-JAX reference of the PyTorch forward, for correctness checking."""
    W1, b1, W2, b2, W3, b3 = params
    x = x_nchw.reshape(x_nchw.shape[0], -1)
    h1 = jnp.maximum(x @ W1.T + b1, 0.0)
    h2 = jnp.maximum(h1 @ W2.T + b2, 0.0)
    return h2 @ W3.T + b3


if __name__ == "__main__":
    key = jax.random.PRNGKey(0)
    kx, kp = jax.random.split(key)

    # Small MNIST-like batch: [B, C, H, W] = [8, 1, 28, 28] -> 784 features.
    x = jax.random.normal(kx, (8, 1, 28, 28), dtype=jnp.float32)
    params = init_params(kp)

    out = net_forward(x, params)
    out = jax.block_until_ready(out)

    ref = reference_forward(x, params)
    assert out.shape == (8, 10), out.shape
    assert jnp.allclose(out, ref, atol=1e-4, rtol=1e-4), "mismatch vs reference"

    print("KERNEL_OK")
</pallas_src>

<mosaic_0001>
module attributes {stable_mosaic.version = 11 : i64} {
  func.func @mlp_kernel(%arg0: i32, %arg1: memref<8x896xf32, #tpu.memory_space<vmem>>, %arg2: memref<896x256xf32, #tpu.memory_space<vmem>>, %arg3: memref<1x256xf32, #tpu.memory_space<vmem>>, %arg4: memref<256x256xf32, #tpu.memory_space<vmem>>, %arg5: memref<1x256xf32, #tpu.memory_space<vmem>>, %arg6: memref<256x128xf32, #tpu.memory_space<vmem>>, %arg7: memref<1x128xf32, #tpu.memory_space<vmem>>, %arg8: memref<8x128xf32, #tpu.memory_space<vmem>>) attributes {dimension_semantics = [#tpu.dimension_semantics<parallel>], iteration_bounds = array<i64: 1>, scalar_prefetch = 0 : i64, scratch_operands = 0 : i64, tpu.core_type = #tpu.core_type<tc>, window_params = [{transform_indices = @transform_0, window_bounds = array<i64: 8, 896>}, {pipeline_mode = #tpu.pipeline_mode<synchronous>, transform_indices = @transform_1, window_bounds = array<i64: 896, 256>}, {pipeline_mode = #tpu.pipeline_mode<synchronous>, transform_indices = @transform_2, window_bounds = array<i64: 1, 256>}, {pipeline_mode = #tpu.pipeline_mode<synchronous>, transform_indices = @transform_3, window_bounds = array<i64: 256, 256>}, {pipeline_mode = #tpu.pipeline_mode<synchronous>, transform_indices = @transform_4, window_bounds = array<i64: 1, 256>}, {pipeline_mode = #tpu.pipeline_mode<synchronous>, transform_indices = @transform_5, window_bounds = array<i64: 256, 128>}, {pipeline_mode = #tpu.pipeline_mode<synchronous>, transform_indices = @transform_6, window_bounds = array<i64: 1, 128>}, {transform_indices = @transform_7, window_bounds = array<i64: 8, 128>}]} {
    %c0 = arith.constant 0 : index
    %c0_0 = arith.constant 0 : index
    %0 = vector.load %arg1[%c0, %c0_0] : memref<8x896xf32, #tpu.memory_space<vmem>>, vector<8x896xf32>
    %c0_1 = arith.constant 0 : index
    %c0_2 = arith.constant 0 : index
    %1 = vector.load %arg2[%c0_1, %c0_2] : memref<896x256xf32, #tpu.memory_space<vmem>>, vector<896x256xf32>
    %cst = arith.constant dense<0.000000e+00> : vector<8x256xf32>
    %2 = tpu.matmul %0, %1, %cst {dimension_numbers = #tpu.dot_dimension_numbers<[1], [0], [0], [1], [0, 0, 1, 1], [], []>} : vector<8x896xf32>, vector<896x256xf32>, vector<8x256xf32> -> vector<8x256xf32>
    %c0_3 = arith.constant 0 : index
    %c0_4 = arith.constant 0 : index
    %3 = vector.load %arg3[%c0_3, %c0_4] : memref<1x256xf32, #tpu.memory_space<vmem>>, vector<1x256xf32>
    %4 = vector.broadcast %3 : vector<1x256xf32> to vector<8x256xf32>
    %5 = arith.addf %2, %4 : vector<8x256xf32>
    %cst_5 = arith.constant 0.000000e+00 : f32
    %6 = vector.broadcast %cst_5 : f32 to vector<8x256xf32>
    %7 = arith.maximumf %5, %6 : vector<8x256xf32>
    %c0_6 = arith.constant 0 : index
    %c0_7 = arith.constant 0 : index
    %8 = vector.load %arg4[%c0_6, %c0_7] : memref<256x256xf32, #tpu.memory_space<vmem>>, vector<256x256xf32>
    %cst_8 = arith.constant dense<0.000000e+00> : vector<8x256xf32>
    %9 = tpu.matmul %7, %8, %cst_8 {dimension_numbers = #tpu.dot_dimension_numbers<[1], [0], [0], [1], [0, 0, 1, 1], [], []>} : vector<8x256xf32>, vector<256x256xf32>, vector<8x256xf32> -> vector<8x256xf32>
    %c0_9 = arith.constant 0 : index
    %c0_10 = arith.constant 0 : index
    %10 = vector.load %arg5[%c0_9, %c0_10] : memref<1x256xf32, #tpu.memory_space<vmem>>, vector<1x256xf32>
    %11 = vector.broadcast %10 : vector<1x256xf32> to vector<8x256xf32>
    %12 = arith.addf %9, %11 : vector<8x256xf32>
    %cst_11 = arith.constant 0.000000e+00 : f32
    %13 = vector.broadcast %cst_11 : f32 to vector<8x256xf32>
    %14 = arith.maximumf %12, %13 : vector<8x256xf32>
    %c0_12 = arith.constant 0 : index
    %c0_13 = arith.constant 0 : index
    %15 = vector.load %arg6[%c0_12, %c0_13] : memref<256x128xf32, #tpu.memory_space<vmem>>, vector<256x128xf32>
    %cst_14 = arith.constant dense<0.000000e+00> : vector<8x128xf32>
    %16 = tpu.matmul %14, %15, %cst_14 {dimension_numbers = #tpu.dot_dimension_numbers<[1], [0], [0], [1], [0, 0, 1, 1], [], []>} : vector<8x256xf32>, vector<256x128xf32>, vector<8x128xf32> -> vector<8x128xf32>
    %c0_15 = arith.constant 0 : index
    %c0_16 = arith.constant 0 : index
    %17 = vector.load %arg7[%c0_15, %c0_16] : memref<1x128xf32, #tpu.memory_space<vmem>>, vector<1x128xf32>
    %18 = vector.broadcast %17 : vector<1x128xf32> to vector<8x128xf32>
    %19 = arith.addf %16, %18 : vector<8x128xf32>
    %c0_17 = arith.constant 0 : index
    %c0_18 = arith.constant 0 : index
    %20 = vector.load %arg8[%c0_17, %c0_18] : memref<8x128xf32, #tpu.memory_space<vmem>>, vector<8x128xf32>
    tpu.vector_store %arg8[%c0_17, %c0_18], %19 {strides = array<i32>} : memref<8x128xf32, #tpu.memory_space<vmem>>, vector<8x128xf32>,
    return
  }
  func.func @transform_0(%arg0: i32) -> (i32, i32) {
    %c0_i32 = arith.constant 0 : i32
    %c0_i32_0 = arith.constant 0 : i32
    return %arg0, %c0_i32 : i32, i32
  }
  func.func @transform_1(%arg0: i32) -> (i32, i32) {
    %c0_i32 = arith.constant 0 : i32
    %c0_i32_0 = arith.constant 0 : i32
    %c0_i32_1 = arith.constant 0 : i32
    return %c0_i32, %c0_i32_0 : i32, i32
  }
  func.func @transform_2(%arg0: i32) -> (i32, i32) {
    %c0_i32 = arith.constant 0 : i32
    %c0_i32_0 = arith.constant 0 : i32
    %c0_i32_1 = arith.constant 0 : i32
    return %c0_i32, %c0_i32_0 : i32, i32
  }
  func.func @transform_3(%arg0: i32) -> (i32, i32) {
    %c0_i32 = arith.constant 0 : i32
    %c0_i32_0 = arith.constant 0 : i32
    %c0_i32_1 = arith.constant 0 : i32
    return %c0_i32, %c0_i32_0 : i32, i32
  }
  func.func @transform_4(%arg0: i32) -> (i32, i32) {
    %c0_i32 = arith.constant 0 : i32
    %c0_i32_0 = arith.constant 0 : i32
    %c0_i32_1 = arith.constant 0 : i32
    return %c0_i32, %c0_i32_0 : i32, i32
  }
  func.func @transform_5(%arg0: i32) -> (i32, i32) {
    %c0_i32 = arith.constant 0 : i32
    %c0_i32_0 = arith.constant 0 : i32
    %c0_i32_1 = arith.constant 0 : i32
    return %c0_i32, %c0_i32_0 : i32, i32
  }
  func.func @transform_6(%arg0: i32) -> (i32, i32) {
    %c0_i32 = arith.constant 0 : i32
    %c0_i32_0 = arith.constant 0 : i32
    %c0_i32_1 = arith.constant 0 : i32
    return %c0_i32, %c0_i32_0 : i32, i32
  }
  func.func @transform_7(%arg0: i32) -> (i32, i32) {
    %c0_i32 = arith.constant 0 : i32
    %c0_i32_0 = arith.constant 0 : i32
    return %arg0, %c0_i32 : i32, i32
  }
}

</mosaic_0001>

<bundles_post_ra>
// kernel: net_forward.1
= control target key start
LH: loop header
LB: loop body
LE: loop exit
PB: predicated region body
PF: predicated region fallthrough
CT: control target
= control target key end

     0   :  { %s2275_s0 = inlined_call_operand.vmem [shape: f32[8,896], index: 0, kind: input, shape index: {}]   ;;  %s2276_s1 = inlined_call_operand.vmem [shape: f32[896,256], index: 1, kind: input, shape index: {}]   ;;  %s2277_s2 = inlined_call_operand.vmem [shape: f32[1,256], index: 2, kind: input, shape index: {}]   ;;  %s2278_s3 = inlined_call_operand.vmem [shape: f32[256,256], index: 3, kind: input, shape index: {}]   ;;  %s2279_s4 = inlined_call_operand.vmem [shape: f32[1,256], index: 4, kind: input, shape index: {}]   ;;  %s2280_s5 = inlined_call_operand.vmem [shape: f32[256,128], index: 5, kind: input, shape index: {}]   ;;  %s2281_s6 = inlined_call_operand.vmem [shape: f32[1,128], index: 6, kind: input, shape index: {}]   ;;  %s2282_s7 = inlined_call_operand.hbm [shape: f32[8,128], index: 7, kind: output, shape index: {}]  }
   0x1   :  { %v99_v0 = vld [vmem:[%s2276_s1 + $0x208] sm:$0xff]  ;;  %v101_v1 = vld [vmem:[%s2276_s1 + $0x218] sm:$0xff]  ;;  %v98_v2 = vld [vmem:[%s2276_s1 + $0x200] sm:$0xff] }
   0x2   :  { %v929_v3 = vpack.c.bf16 %v101_v1, %v99_v0  ;;  %v100_v4 = vld [vmem:[%s2276_s1 + $0x210] sm:$0xff]  ;;  %v103_v5 = vld [vmem:[%s2276_s1 + $0x228] sm:$0xff]  ;;  %v105_v6 = vld [vmem:[%s2276_s1 + $0x238] sm:$0xff] }
   0x3   :  { %v931_v7 = vpack.c.bf16 %v100_v4, %v98_v2  ;;  %v933_v8 = vpack.c.bf16 %v105_v6, %v103_v5  ;;  %v102_v9 = vld [vmem:[%s2276_s1 + $0x220] sm:$0xff]  ;;  %v104_v10 = vld [vmem:[%s2276_s1 + $0x230] sm:$0xff]  ;;  %v107_v11 = vld [vmem:[%s2276_s1 + $0x248] sm:$0xff] }
   0x4   :  { %930 = vmatprep.subr.bf16.mxu0 %v929_v3  ;;  %v109_v12 = vld [vmem:[%s2276_s1 + $0x258] sm:$0xff]  ;;  %v935_v13 = vpack.c.bf16 %v104_v10, %v102_v9  ;;  %v106_v15 = vld [vmem:[%s2276_s1 + $0x240] sm:$0xff]  ;;  %v108_v16 = vld [vmem:[%s2276_s1 + $0x250] sm:$0xff] }
   0x5   :  { %932 = vmatpush1.bf16.msra.mxu0 %v931_v7  ;;  %v937_v14 = vpack.c.bf16 %v109_v12, %v107_v11  ;;  %v111_v17 = vld [vmem:[%s2276_s1 + $0x268] sm:$0xff]  ;;  %v113_v18 = vld [vmem:[%s2276_s1 + $0x278] sm:$0xff]  ;;  %v939_v19 = vpack.c.bf16 %v108_v16, %v106_v15  ;;  %v110_v21 = vld [vmem:[%s2276_s1 + $0x260] sm:$0xff] }
   0x6   :  { %934 = vmatprep.subr.bf16.mxu0 %v933_v8  ;;  %v941_v20 = vpack.c.bf16 %v113_v18, %v111_v17  ;;  %v112_v22 = vld [vmem:[%s2276_s1 + $0x270] sm:$0xff]  ;;  %v115_v23 = vld [vmem:[%s2276_s1 + $0x288] sm:$0xff]  ;;  %v117_v24 = vld [vmem:[%s2276_s1 + $0x298] sm:$0xff] }
   0x7   :  { %v943_v25 = vpack.c.bf16 %v112_v22, %v110_v21  ;;  %v945_v26 = vpack.c.bf16 %v117_v24, %v115_v23  ;;  %v114_v27 = vld [vmem:[%s2276_s1 + $0x280] sm:$0xff]  ;;  %v116_v28 = vld [vmem:[%s2276_s1 + $0x290] sm:$0xff]  ;;  %v119_v29 = vld [vmem:[%s2276_s1 + $0x2a8] sm:$0xff] }
   0x8   :  { %v121_v30 = vld [vmem:[%s2276_s1 + $0x2b8] sm:$0xff]  ;;  %v947_v31 = vpack.c.bf16 %v116_v28, %v114_v27  ;;  %v118_v33 = vld [vmem:[%s2276_s1 + $0x2a0] sm:$0xff]  ;;  %v120_v34 = vld [vmem:[%s2276_s1 + $0x2b0] sm:$0xff] }
   0x9   :  { %936 = vmatpush1.bf16.msra.mxu0 %v935_v13  ;;  %v949_v32 = vpack.c.bf16 %v121_v30, %v119_v29  ;;  %v123_v35 = vld [vmem:[%s2276_s1 + $0x2c8] sm:$0xff]  ;;  %v125_v36 = vld [vmem:[%s2276_s1 + $0x2d8] sm:$0xff]  ;;  %v951_v37 = vpack.c.bf16 %v120_v34, %v118_v33  ;;  %v122_v39 = vld [vmem:[%s2276_s1 + $0x2c0] sm:$0xff] }
   0xa   :  { %938 = vmatprep.subr.bf16.mxu0 %v937_v14  ;;  %v953_v38 = vpack.c.bf16 %v125_v36, %v123_v35  ;;  %v124_v40 = vld [vmem:[%s2276_s1 + $0x2d0] sm:$0xff]  ;;  %v30_v41 = vld [vmem:[%s2275_s0 + $0x18] sm:$0xff]  ;;  %v127_v42 = vld [vmem:[%s2276_s1 + $0x2e8] sm:$0xff] }
   0xb   :  { %v129_v43 = vld [vmem:[%s2276_s1 + $0x2f8] sm:$0xff]  ;;  %405 = vmatprep.mubr.f32.mxu0 %v30_v41  ;;  %v955_v44 = vpack.c.bf16 %v124_v40, %v122_v39  ;;  %v126_v46 = vld [vmem:[%s2276_s1 + $0x2e0] sm:$0xff]  ;;  %v128_v47 = vld [vmem:[%s2276_s1 + $0x2f0] sm:$0xff] }
   0xc   :  { %v957_v45 = vpack.c.bf16 %v129_v43, %v127_v42  ;;  %v131_v48 = vld [vmem:[%s2276_s1 + $0x308] sm:$0xff]  ;;  %v133_v49 = vld [vmem:[%s2276_s1 + $0x318] sm:$0xff]  ;;  %v959_v50 = vpack.c.bf16 %v128_v47, %v126_v46  ;;  %v130_v52 = vld [vmem:[%s2276_s1 + $0x300] sm:$0xff] }
   0xd   :  { %940 = vmatpush1.bf16.msra.mxu0 %v939_v19  ;;  %v961_v51 = vpack.c.bf16 %v133_v49, %v131_v48  ;;  %v132_v53 = vld [vmem:[%s2276_s1 + $0x310] sm:$0xff]  ;;  %v135_v54 = vld [vmem:[%s2276_s1 + $0x328] sm:$0xff]  ;;  %v137_v55 = vld [vmem:[%s2276_s1 + $0x338] sm:$0xff] }
   0xe   :  { %942 = vmatprep.subr.bf16.mxu0 %v941_v20  ;;  %v963_v56 = vpack.c.bf16 %v132_v53, %v130_v52  ;;  %v134_v57 = vld [vmem:[%s2276_s1 + $0x320] sm:$0xff]  ;;  %v35_v58 = vld [vmem:[%s2276_s1 + $0x8] sm:$0xff]  ;;  %v37_v59 = vld [vmem:[%s2276_s1 + $0x18] sm:$0xff]  ;;  %v965_v60 = vpack.c.bf16 %v137_v55, %v135_v54 }
   0xf   :  { %v136_v61 = vld [vmem:[%s2276_s1 + $0x330] sm:$0xff]  ;;  %v865_v62 = vpack.c.bf16 %v37_v59, %v35_v58  ;;  %v34_v63 = vld [vmem:[%s2276_s1] sm:$0xff]  ;;  %v139_v1 = vld [vmem:[%s2276_s1 + $0x348] sm:$0xff] }
  0x10   :  { %v36_v0 = vld [vmem:[%s2276_s1 + $0x10] sm:$0xff]  ;;  %v141_v2 = vld [vmem:[%s2276_s1 + $0x358] sm:$0xff]  ;;  %v39_v4 = vld [vmem:[%s2276_s1 + $0x28] sm:$0xff]  ;;  %v967_v6 = vpack.c.bf16 %v136_v61, %v134_v57 }
  0x11   :  { %944 = vmatpush1.bf16.msra.mxu0 %v943_v25  ;;  %v867_v3 = vpack.c.bf16 %v36_v0, %v34_v63  ;;  %866 = vmatprep.subr.bf16.mxu1 %v865_v62  ;;  %v41_v5 = vld [vmem:[%s2276_s1 + $0x38] sm:$0xff]  ;;  %v138_v7 = vld [vmem:[%s2276_s1 + $0x340] sm:$0xff]  ;;  %v40_v10 = vld [vmem:[%s2276_s1 + $0x30] sm:$0xff]  ;;  %v969_v11 = vpack.c.bf16 %v141_v2, %v139_v1 }
  0x12   :  { %946 = vmatprep.subr.bf16.mxu0 %v945_v26  ;;  %v869_v8 = vpack.c.bf16 %v41_v5, %v39_v4  ;;  %v38_v9 = vld [vmem:[%s2276_s1 + $0x20] sm:$0xff]  ;;  %v140_v12 = vld [vmem:[%s2276_s1 + $0x350] sm:$0xff]  ;;  %v43_v14 = vld [vmem:[%s2276_s1 + $0x48] sm:$0xff] }
  0x13   :  { %868 = vmatpush1.bf16.msra.mxu1 %v867_v3  ;;  %v871_v13 = vpack.c.bf16 %v40_v10, %v38_v9  ;;  %v45_v15 = vld [vmem:[%s2276_s1 + $0x58] sm:$0xff]  ;;  %v143_v16 = vld [vmem:[%s2276_s1 + $0x368] sm:$0xff]  ;;  %v42_v19 = vld [vmem:[%s2276_s1 + $0x40] sm:$0xff]  ;;  %v971_v21 = vpack.c.bf16 %v140_v12, %v138_v7 }
  0x14   :  { %v145_v17 = vld [vmem:[%s2276_s1 + $0x378] sm:$0xff]  ;;  %870 = vmatprep.subr.bf16.mxu1 %v869_v8  ;;  %v873_v18 = vpack.c.bf16 %v45_v15, %v43_v14  ;;  %v44_v20 = vld [vmem:[%s2276_s1 + $0x50] sm:$0xff]  ;;  %v142_v22 = vld [vmem:[%s2276_s1 + $0x360] sm:$0xff] }
  0x15   :  { %948 = vmatpush1.bf16.msra.mxu0 %v947_v31  ;;  %v875_v23 = vpack.c.bf16 %v44_v20, %v42_v19  ;;  %v47_v24 = vld [vmem:[%s2276_s1 + $0x68] sm:$0xff]  ;;  %v49_v25 = vld [vmem:[%s2276_s1 + $0x78] sm:$0xff]  ;;  %v973_v26 = vpack.c.bf16 %v145_v17, %v143_v16  ;;  %v144_v27 = vld [vmem:[%s2276_s1 + $0x370] sm:$0xff] }
  0x16   :  { %950 = vmatprep.subr.bf16.mxu0 %v949_v32  ;;  %v877_v28 = vpack.c.bf16 %v49_v25, %v47_v24  ;;  %v46_v29 = vld [vmem:[%s2276_s1 + $0x60] sm:$0xff]  ;;  %v48_v30 = vld [vmem:[%s2276_s1 + $0x70] sm:$0xff]  ;;  %v147_v31 = vld [vmem:[%s2276_s1 + $0x388] sm:$0xff]  ;;  %v975_v35 = vpack.c.bf16 %v144_v27, %v142_v22 }
  0x17   :  { %872 = vmatpush1.bf16.msra.mxu1 %v871_v13  ;;  %v149_v32 = vld [vmem:[%s2276_s1 + $0x398] sm:$0xff]  ;;  %v51_v33 = vld [vmem:[%s2276_s1 + $0x88] sm:$0xff]  ;;  %v146_v36 = vld [vmem:[%s2276_s1 + $0x380] sm:$0xff] }
  0x18   :  { %874 = vmatprep.subr.bf16.mxu1 %v873_v18  ;;  %v53_v34 = vld [vmem:[%s2276_s1 + $0x98] sm:$0xff]  ;;  %v977_v39 = vpack.c.bf16 %v149_v32, %v147_v31  ;;  %v151_v40 = vld [vmem:[%s2276_s1 + $0x3a8] sm:$0xff]  ;;  %v50_v42 = vld [vmem:[%s2276_s1 + $0x80] sm:$0xff] }
  0x19   :  { %952 = vmatpush1.bf16.msra.mxu0 %v951_v37  ;;  %v148_v37 = vld [vmem:[%s2276_s1 + $0x390] sm:$0xff]  ;;  %v881_v41 = vpack.c.bf16 %v53_v34, %v51_v33  ;;  %v57_v46 = vld [vmem:[%s2276_s1 + $0xb8] sm:$0xff]  ;;  %v150_v48 = vld [vmem:[%s2276_s1 + $0x3a0] sm:$0xff] }
  0x1a   :  { %954 = vmatprep.subr.bf16.mxu0 %v953_v38  ;;  %v879_v38 = vpack.c.bf16 %v48_v30, %v46_v29  ;;  %v52_v43 = vld [vmem:[%s2276_s1 + $0x90] sm:$0xff]  ;;  %v979_v47 = vpack.c.bf16 %v148_v37, %v146_v36  ;;  %v155_v52 = vld [vmem:[%s2276_s1 + $0x3c8] sm:$0xff]  ;;  %v54_v54 = vld [vmem:[%s2276_s1 + $0xa0] sm:$0xff] }
  0x1b   :  { %876 = vmatpush1.bf16.msra.mxu1 %v875_v23  ;;  %v152_v49 = vld [vmem:[%s2276_s1 + $0x3b0] sm:$0xff]  ;;  %v59_v57 = vld [vmem:[%s2276_s1 + $0xc8] sm:$0xff]  ;;  %v61_v58 = vld [vmem:[%s2276_s1 + $0xd8] sm:$0xff] }
  0x1c   :  { %878 = vmatprep.subr.bf16.mxu1 %v877_v28  ;;  %v56_v55 = vld [vmem:[%s2276_s1 + $0xb0] sm:$0xff]  ;;  %v983_v59 = vpack.c.bf16 %v152_v49, %v150_v48  ;;  %v159_v0 = vld [vmem:[%s2276_s1 + $0x3e8] sm:$0xff]  ;;  %v889_v1 = vpack.c.bf16 %v61_v58, %v59_v57  ;;  %v58_v2 = vld [vmem:[%s2276_s1 + $0xc0] sm:$0xff] }
  0x1d   :  { %956 = vmatpush1.bf16.msra.mxu0 %v955_v44  ;;  %v153_v44 = vld [vmem:[%s2276_s1 + $0x3b8] sm:$0xff]  ;;  %v156_v61 = vld [vmem:[%s2276_s1 + $0x3d0] sm:$0xff]  ;;  %v887_v62 = vpack.c.bf16 %v56_v55, %v54_v54  ;;  %v63_v5 = vld [vmem:[%s2276_s1 + $0xe8] sm:$0xff] }
  0x1e   :  { %958 = vmatprep.subr.bf16.mxu0 %v957_v45  ;;  %v55_v45 = vld [vmem:[%s2276_s1 + $0xa8] sm:$0xff]  ;;  %v60_v3 = vld [vmem:[%s2276_s1 + $0xd0] sm:$0xff]  ;;  %v161_v4 = vld [vmem:[%s2276_s1 + $0x3f8] sm:$0xff] }
  0x1f   :  { %880 = vmatpush1.bf16.msra.mxu1 %v879_v38  ;;  %v885_v53 = vpack.c.bf16 %v57_v46, %v55_v45  ;;  %v158_v8 = vld [vmem:[%s2276_s1 + $0x3e0] sm:$0xff]  ;;  %v160_v9 = vld [vmem:[%s2276_s1 + $0x3f0] sm:$0xff]  ;;  %v891_v10 = vpack.c.bf16 %v60_v3, %v58_v2  ;;  %v163_v12 = vld [vmem:[%s2276_s1 + $0x408] sm:$0xff] }
  0x20   :  { %882 = vmatprep.subr.bf16.mxu1 %v881_v41  ;;  %v62_v14 = vld [vmem:[%s2276_s1 + $0xe0] sm:$0xff]  ;;  %v64_v15 = vld [vmem:[%s2276_s1 + $0xf0] sm:$0xff]  ;;  %v165_v16 = vld [vmem:[%s2276_s1 + $0x418] sm:$0xff]  ;;  %v991_v19 = vpack.c.bf16 %v160_v9, %v158_v8 }
  0x21   :  { %960 = vmatpush1.bf16.msra.mxu0 %v959_v50  ;;  %v883_v50 = vpack.c.bf16 %v52_v43, %v50_v42  ;;  %v67_v17 = vld [vmem:[%s2276_s1 + $0x108] sm:$0xff]  ;;  %v69_v18 = vld [vmem:[%s2276_s1 + $0x118] sm:$0xff]  ;;  %v162_v20 = vld [vmem:[%s2276_s1 + $0x400] sm:$0xff]  ;;  %v993_v22 = vpack.c.bf16 %v165_v16, %v163_v12 }
  0x22   :  { %962 = vmatprep.subr.bf16.mxu0 %v961_v51  ;;  %v981_v51 = vpack.c.bf16 %v153_v44, %v151_v40  ;;  %v164_v23 = vld [vmem:[%s2276_s1 + $0x410] sm:$0xff]  ;;  %v897_v24 = vpack.c.bf16 %v69_v18, %v67_v17  ;;  %v66_v25 = vld [vmem:[%s2276_s1 + $0x100] sm:$0xff]  ;;  %v167_v27 = vld [vmem:[%s2276_s1 + $0x428] sm:$0xff] }
  0x23   :  { %884 = vmatpush1.bf16.msra.mxu1 %v883_v50  ;;  %v169_v28 = vld [vmem:[%s2276_s1 + $0x438] sm:$0xff]  ;;  %v29_v29 = vld [vmem:[%s2275_s0 + $0x10] sm:$0xff]  ;;  %v71_v30 = vld [vmem:[%s2276_s1 + $0x128] sm:$0xff]  ;;  %v995_v32 = vpack.c.bf16 %v164_v23, %v162_v20 }
  0x24   :  { %886 = vmatprep.subr.bf16.mxu1 %v885_v53  ;;  %v73_v31 = vld [vmem:[%s2276_s1 + $0x138] sm:$0xff]  ;;  %v166_v33 = vld [vmem:[%s2276_s1 + $0x420] sm:$0xff]  ;;  %v168_v34 = vld [vmem:[%s2276_s1 + $0x430] sm:$0xff]  ;;  %v997_v37 = vpack.c.bf16 %v169_v28, %v167_v27 }
  0x25   :  { %964 = vmatpush1.bf16.msra.mxu0 %v963_v56  ;;  %v157_v56 = vld [vmem:[%s2276_s1 + $0x3d8] sm:$0xff]  ;;  %v72_v40 = vld [vmem:[%s2276_s1 + $0x130] sm:$0xff]  ;;  %v32_v41 = vld [vmem:[%s2275_s0 + $0x28] sm:$0xff]  ;;  %v901_v42 = vpack.c.bf16 %v73_v31, %v71_v30  ;;  %v999_v45 = vpack.c.bf16 %v168_v34, %v166_v33 }
  0x26   :  { %966 = vmatprep.subr.bf16.mxu0 %v965_v60  ;;  %v154_v60 = vld [vmem:[%s2276_s1 + $0x3c0] sm:$0xff]  ;;  %v985_v63 = vpack.c.bf16 %v157_v56, %v155_v52  ;;  %v173_v38 = vld [vmem:[%s2276_s1 + $0x458] sm:$0xff]  ;;  %v75_v43 = vld [vmem:[%s2276_s1 + $0x148] sm:$0xff] }
  0x27   :  { %v987_v7 = vpack.c.bf16 %v156_v61, %v154_v60  ;;  %888 = vmatpush1.bf16.msra.mxu1 %v887_v62  ;;  %v77_v44 = vld [vmem:[%s2276_s1 + $0x158] sm:$0xff]  ;;  %v170_v46 = vld [vmem:[%s2276_s1 + $0x440] sm:$0xff]  ;;  %v175_v50 = vld [vmem:[%s2276_s1 + $0x468] sm:$0xff] }
  0x28   :  { %890 = vmatprep.subr.bf16.mxu1 %v889_v1  ;;  %v74_v52 = vld [vmem:[%s2276_s1 + $0x140] sm:$0xff]  ;;  %v76_v53 = vld [vmem:[%s2276_s1 + $0x150] sm:$0xff]  ;;  %v177_v54 = vld [vmem:[%s2276_s1 + $0x478] sm:$0xff] }
  0x29   :  { %968 = vmatpush1.bf16.msra.mxu0 %v967_v6  ;;  %v65_v6 = vld [vmem:[%s2276_s1 + $0xf8] sm:$0xff]  ;;  %v79_v55 = vld [vmem:[%s2276_s1 + $0x168] sm:$0xff]  ;;  %v174_v58 = vld [vmem:[%s2276_s1 + $0x460] sm:$0xff]  ;;  %v907_v61 = vpack.c.bf16 %v76_v53, %v74_v52  ;;  %v1005_v62 = vpack.c.bf16 %v177_v54, %v175_v50 }
  0x2a   :  { %970 = vmatprep.subr.bf16.mxu0 %v969_v11  ;;  %v989_v11 = vpack.c.bf16 %v161_v4, %v159_v0  ;;  %v893_v13 = vpack.c.bf16 %v65_v6, %v63_v5  ;;  %v81_v56 = vld [vmem:[%s2276_s1 + $0x178] sm:$0xff]  ;;  %v179_v60 = vld [vmem:[%s2276_s1 + $0x488] sm:$0xff]  ;;  %v78_v1 = vld [vmem:[%s2276_s1 + $0x160] sm:$0xff] }
  0x2b   :  { %892 = vmatpush1.bf16.msra.mxu1 %v891_v10  ;;  %v909_v0 = vpack.c.bf16 %v81_v56, %v79_v55  ;;  %v80_v2 = vld [vmem:[%s2276_s1 + $0x170] sm:$0xff]  ;;  %v83_v3 = vld [vmem:[%s2276_s1 + $0x188] sm:$0xff]  ;;  %v85_v4 = vld [vmem:[%s2276_s1 + $0x198] sm:$0xff] }
  0x2c   :  { %894 = vmatprep.subr.bf16.mxu1 %v893_v13  ;;  %v28_v5 = vld [vmem:[%s2275_s0 + $0x8] sm:$0xff]  ;;  %v180_v8 = vld [vmem:[%s2276_s1 + $0x490] sm:$0xff]  ;;  %v911_v9 = vpack.c.bf16 %v80_v2, %v78_v1  ;;  %v913_v12 = vpack.c.bf16 %v85_v4, %v83_v3  ;;  %v82_v13 = vld [vmem:[%s2276_s1 + $0x180] sm:$0xff] }
  0x2d   :  { %972 = vmatpush1.bf16.msra.mxu0 %v971_v21  ;;  %v895_v21 = vpack.c.bf16 %v64_v15, %v62_v14  ;;  %334 = vmatprep.mubr.f32.mxu1 %v28_v5  ;;  %v84_v14 = vld [vmem:[%s2276_s1 + $0x190] sm:$0xff]  ;;  %v185_v15 = vld [vmem:[%s2276_s1 + $0x4b8] sm:$0xff]  ;;  %v87_v16 = vld [vmem:[%s2276_s1 + $0x1a8] sm:$0xff] }
  0x2e   :  { %974 = vmatprep.subr.bf16.mxu0 %v973_v26  ;;  %v68_v26 = vld [vmem:[%s2276_s1 + $0x110] sm:$0xff]  ;;  %v89_v17 = vld [vmem:[%s2276_s1 + $0x1b8] sm:$0xff]  ;;  %v187_v23 = vld [vmem:[%s2276_s1 + $0x4c8] sm:$0xff] }
  0x2f   :  { %896 = vmatpush1.bf16.msra.mxu1 %v895_v21  ;;  %v899_v36 = vpack.c.bf16 %v68_v26, %v66_v25  ;;  %v184_v20 = vld [vmem:[%s2276_s1 + $0x4b0] sm:$0xff]  ;;  %v915_v21 = vpack.c.bf16 %v84_v14, %v82_v13  ;;  %v86_v25 = vld [vmem:[%s2276_s1 + $0x1a0] sm:$0xff]  ;;  %v189_v27 = vld [vmem:[%s2276_s1 + $0x4d8] sm:$0xff] }
  0x30   :  { %898 = vmatprep.subr.bf16.mxu1 %v897_v24  ;;  %v917_v24 = vpack.c.bf16 %v89_v17, %v87_v16  ;;  %v88_v26 = vld [vmem:[%s2276_s1 + $0x1b0] sm:$0xff]  ;;  %v91_v28 = vld [vmem:[%s2276_s1 + $0x1c8] sm:$0xff]  ;;  %v186_v31 = vld [vmem:[%s2276_s1 + $0x4c0] sm:$0xff]  ;;  %v1017_v34 = vpack.c.bf16 %v189_v27, %v187_v23 }
  0x31   :  { %976 = vmatpush1.bf16.msra.mxu0 %v975_v35  ;;  %v171_v35 = vld [vmem:[%s2276_s1 + $0x448] sm:$0xff]  ;;  %v919_v33 = vpack.c.bf16 %v88_v26, %v86_v25  ;;  %v96_v50 = vld [vmem:[%s2276_s1 + $0x1f0] sm:$0xff]  ;;  %v559_v53 = vld [vmem:[%s2278_s3 + $0x18] sm:$0xff] }
  0x32   :  { %978 = vmatprep.subr.bf16.mxu0 %v977_v39  ;;  %v70_v39 = vld [vmem:[%s2276_s1 + $0x120] sm:$0xff]  ;;  %v1001_v49 = vpack.c.bf16 %v173_v38, %v171_v35  ;;  %v191_v35 = vld [vmem:[%s2276_s1 + $0x4e8] sm:$0xff]  ;;  %v92_v38 = vld [vmem:[%s2276_s1 + $0x1d0] sm:$0xff] }
  0x33   :  { %900 = vmatpush1.bf16.msra.mxu1 %v899_v36  ;;  %v903_v48 = vpack.c.bf16 %v72_v40, %v70_v39  ;;  %v193_v39 = vld [vmem:[%s2276_s1 + $0x4f8] sm:$0xff]  ;;  %v95_v40 = vld [vmem:[%s2276_s1 + $0x1e8] sm:$0xff]  ;;  %v194_v55 = vld [vmem:[%s2276_s1 + $0x500] sm:$0xff] }
  0x34   :  { %902 = vmatprep.subr.bf16.mxu1 %v901_v42  ;;  %v557_v52 = vld [vmem:[%s2278_s3 + $0x8] sm:$0xff]  ;;  %v196_v56 = vld [vmem:[%s2276_s1 + $0x510] sm:$0xff]  ;;  %v563_v1 = vld [vmem:[%s2278_s3 + $0x38] sm:$0xff] }
  0x35   :  { %980 = vmatpush1.bf16.msra.mxu0 %v979_v47  ;;  %v172_v47 = vld [vmem:[%s2276_s1 + $0x450] sm:$0xff]  ;;  %v198_v2 = vld [vmem:[%s2276_s1 + $0x520] sm:$0xff]  ;;  %v1027_v3 = vpack.c.bf16 %v196_v56, %v194_v55 }
  0x36   :  { %982 = vmatprep.subr.bf16.mxu0 %v981_v51  ;;  %v905_v51 = vpack.c.bf16 %v77_v44, %v75_v43  ;;  %v1003_v57 = vpack.c.bf16 %v172_v47, %v170_v46  ;;  %v190_v43 = vld [vmem:[%s2276_s1 + $0x4e0] sm:$0xff]  ;;  %v192_v44 = vld [vmem:[%s2276_s1 + $0x4f0] sm:$0xff]  ;;  %v1021_v46 = vpack.c.bf16 %v193_v39, %v191_v35  ;;  %v195_v47 = vld [vmem:[%s2276_s1 + $0x508] sm:$0xff] }
  0x37   :  { %904 = vmatpush1.bf16.msra.mxu1 %v903_v48  ;;  %v1023_v54 = vpack.c.bf16 %v192_v44, %v190_v43  ;;  %v200_v4 = vld [vmem:[%s2276_s1 + $0x530] sm:$0xff]  ;;  %v27_v5 = vld [vmem:[%s2275_s0] sm:$0xff] }
  0x38   :  { %906 = vmatprep.subr.bf16.mxu1 %v905_v51  ;;  %v197_v51 = vld [vmem:[%s2276_s1 + $0x518] sm:$0xff] }
  0x39   :  { %984 = vmatpush1.bf16.msra.mxu0 %v983_v59  ;;  %v176_v59 = vld [vmem:[%s2276_s1 + $0x470] sm:$0xff] }
  0x3a   :  { %986 = vmatprep.subr.bf16.mxu0 %v985_v63  ;;  %v181_v63 = vld [vmem:[%s2276_s1 + $0x498] sm:$0xff]  ;;  %v1007_v6 = vpack.c.bf16 %v176_v59, %v174_v58  ;;  %v1025_v58 = vpack.c.bf16 %v197_v51, %v195_v47  ;;  %v199_v59 = vld [vmem:[%s2276_s1 + $0x528] sm:$0xff] }
  0x3b   :  { %908 = vmatpush1.bf16.msra.mxu1 %v907_v61  ;;  %v1009_v10 = vpack.c.bf16 %v181_v63, %v179_v60  ;;  %v1089_v60 = vpack.c.bf16 %v559_v53, %v557_v52  ;;  %v556_v61 = vld [vmem:[%s2278_s3] sm:$0xff]  ;;  %v201_v63 = vld [vmem:[%s2276_s1 + $0x538] sm:$0xff] }
  0x3c   :  { %910 = vmatprep.subr.bf16.mxu1 %v909_v0  ;;  %v561_v0 = vld [vmem:[%s2278_s3 + $0x28] sm:$0xff] }
  0x3d   :  { %988 = vmatpush1.bf16.msra.mxu0 %v987_v7  ;;  %v178_v7 = vld [vmem:[%s2276_s1 + $0x480] sm:$0xff] }
  0x3e   :  { %990 = vmatprep.subr.bf16.mxu0 %v989_v11  ;;  %v183_v11 = vld [vmem:[%s2276_s1 + $0x4a8] sm:$0xff]  ;;  %v1011_v18 = vpack.c.bf16 %v180_v8, %v178_v7 }
  0x3f   :  { %912 = vmatpush1.bf16.msra.mxu1 %v911_v9 }
  0x40   :  { %914 = vmatprep.subr.bf16.mxu1 %v913_v12 }
  0x41   :  { %992 = vmatpush1.bf16.msra.mxu0 %v991_v19  ;;  %v182_v19 = vld [vmem:[%s2276_s1 + $0x4a0] sm:$0xff] }
  0x42   :  { %994 = vmatprep.subr.bf16.mxu0 %v993_v22  ;;  %v1013_v22 = vpack.c.bf16 %v185_v15, %v183_v11  ;;  %v1015_v30 = vpack.c.bf16 %v184_v20, %v182_v19 }
  0x43   :  { %916 = vmatpush1.bf16.msra.mxu1 %v915_v21 }
  0x44   :  { %406 = vmatmul.mubr.f32.vlgmr.msra.gmra.mrb[0].mxu0 %v29_v29  ;;  %v93_v29 = vld [vmem:[%s2276_s1 + $0x1d8] sm:$0xff]  ;;  %918 = vmatprep.subr.bf16.mxu1 %v917_v24 }
  0x45   :  { %996 = vmatpush1.bf16.msra.mxu0 %v995_v32  ;;  %476 = vmatprep.mubr.f32.mxu0 %v32_v41  ;;  %v188_v32 = vld [vmem:[%s2276_s1 + $0x4d0] sm:$0xff]  ;;  %v921_v36 = vpack.c.bf16 %v93_v29, %v91_v28  ;;  %v97_v41 = vld [vmem:[%s2276_s1 + $0x1f8] sm:$0xff] }
  0x46   :  { %998 = vmatprep.subr.bf16.mxu0 %v997_v37  ;;  %v90_v37 = vld [vmem:[%s2276_s1 + $0x1c0] sm:$0xff]  ;;  %v1019_v42 = vpack.c.bf16 %v188_v32, %v186_v31  ;;  %v925_v48 = vpack.c.bf16 %v97_v41, %v95_v40 }
  0x47   :  { %920 = vmatpush1.bf16.msra.mxu1 %v919_v33 }
  0x48   :  { %922 = vmatprep.subr.bf16.mxu1 %v921_v36 }
  0x49   :  { %1000 = vmatpush1.bf16.msra.mxu0 %v999_v45  ;;  %v923_v45 = vpack.c.bf16 %v92_v38, %v90_v37 }
  0x4a   :  { %1002 = vmatprep.subr.bf16.mxu0 %v1001_v49  ;;  %v94_v49 = vld [vmem:[%s2276_s1 + $0x1e0] sm:$0xff] }
  0x4b   :  { %924 = vmatpush1.bf16.msra.mxu1 %v923_v45 }
  0x4c   :  { %926 = vmatprep.subr.bf16.mxu1 %v925_v48 }
  0x4d   :  { %1004 = vmatpush1.bf16.msra.mxu0 %v1003_v57  ;;  %v927_v57 = vpack.c.bf16 %v96_v50, %v94_v49 }
  0x4e   :  { %1006 = vmatprep.subr.bf16.mxu0 %v1005_v62  ;;  %v558_v62 = vld [vmem:[%s2278_s3 + $0x10] sm:$0xff] }
  0x4f   :  { %928 = vmatpush1.bf16.msra.mxu1 %v927_v57 }
  0x51   :  { %1008 = vmatpush1.bf16.msra.mxu0 %v1007_v6  ;;  %v1091_v6 = vpack.c.bf16 %v558_v62, %v556_v61 }
  0x52   :  { %1010 = vmatprep.subr.bf16.mxu0 %v1009_v10 }
  0x55   :  { %1012 = vmatpush1.bf16.msra.mxu0 %v1011_v18 }
  0x56   :  { %1014 = vmatprep.subr.bf16.mxu0 %v1013_v22 }
  0x59   :  { %1016 = vmatpush1.bf16.msra.mxu0 %v1015_v30 }
  0x5a   :  { %1018 = vmatprep.subr.bf16.mxu0 %v1017_v34 }
  0x5d   :  { %1020 = vmatpush1.bf16.msra.mxu0 %v1019_v42 }
  0x5e   :  { %1022 = vmatprep.subr.bf16.mxu0 %v1021_v46 }
  0x61   :  { %1024 = vmatpush1.bf16.msra.mxu0 %v1023_v54 }
  0x62   :  { %12 = vsyncpa [#allocation3], 0  ;;  %1026 = vmatprep.subr.bf16.mxu0 %v1025_v58  ;;  %v1029_v7 = vpack.c.bf16 %v201_v63, %v199_v59  ;;  %v203_v8 = vld [vmem:[%s2276_s1 + $0x548] sm:$0xff]  ;;  %1090 = vmatprep.subr.bf16.mxu1 %v1089_v60  ;;  %v1093_v9 = vpack.c.bf16 %v563_v1, %v561_v0  ;;  %v560_v10 = vld [vmem:[%s2278_s3 + $0x20] sm:$0xff]  ;;  %v1031_v15 = vpack.c.bf16 %v200_v4, %v198_v2 }
  0x63   :  { %v562_v11 = vld [vmem:[%s2278_s3 + $0x30] sm:$0xff]  ;;  %v205_v12 = vld [vmem:[%s2276_s1 + $0x558] sm:$0xff]  ;;  %v565_v13 = vld [vmem:[%s2278_s3 + $0x48] sm:$0xff]  ;;  %335 = vmatmul.mubr.f32.vlgmr.msra.gmra.mrb[0].mxu1 %v27_v5 }
  0x64   :  { %v567_v14 = vld [vmem:[%s2278_s3 + $0x58] sm:$0xff]  ;;  %v202_v16 = vld [vmem:[%s2276_s1 + $0x540] sm:$0xff]  ;;  %v204_v17 = vld [vmem:[%s2276_s1 + $0x550] sm:$0xff]  ;;  %1092 = vmatpush1.bf16.msra.mxu1 %v1091_v6  ;;  %v1095_v18 = vpack.c.bf16 %v562_v11, %v560_v10  ;;  %v1033_v19 = vpack.c.bf16 %v205_v12, %v203_v8 }
  0x65   :  { %1028 = vmatpush1.bf16.msra.mxu0 %v1027_v3  ;;  %v207_v20 = vld [vmem:[%s2276_s1 + $0x568] sm:$0xff]  ;;  %1094 = vmatprep.subr.bf16.mxu1 %v1093_v9  ;;  %v1097_v21 = vpack.c.bf16 %v567_v14, %v565_v13  ;;  %v564_v22 = vld [vmem:[%s2278_s3 + $0x40] sm:$0xff]  ;;  %v566_v23 = vld [vmem:[%s2278_s3 + $0x50] sm:$0xff]  ;;  %v1035_v27 = vpack.c.bf16 %v204_v17, %v202_v16 }
  0x66   :  { %1030 = vmatprep.subr.bf16.mxu0 %v1029_v7  ;;  %v209_v24 = vld [vmem:[%s2276_s1 + $0x578] sm:$0xff]  ;;  %v569_v25 = vld [vmem:[%s2278_s3 + $0x68] sm:$0xff]  ;;  %v206_v28 = vld [vmem:[%s2276_s1 + $0x560] sm:$0xff]  ;;  %v1099_v30 = vpack.c.bf16 %v566_v23, %v564_v22 }
  0x67   :  { %v571_v26 = vld [vmem:[%s2278_s3 + $0x78] sm:$0xff]  ;;  %v208_v29 = vld [vmem:[%s2276_s1 + $0x570] sm:$0xff]  ;;  %v1037_v31 = vpack.c.bf16 %v209_v24, %v207_v20  ;;  %v211_v32 = vld [vmem:[%s2276_s1 + $0x588] sm:$0xff] }
  0x68   :  { %1096 = vmatpush1.bf16.msra.mxu1 %v1095_v18  ;;  %v1101_v33 = vpack.c.bf16 %v571_v26, %v569_v25  ;;  %v568_v34 = vld [vmem:[%s2278_s3 + $0x60] sm:$0xff]  ;;  %v570_v35 = vld [vmem:[%s2278_s3 + $0x70] sm:$0xff]  ;;  %v213_v36 = vld [vmem:[%s2276_s1 + $0x598] sm:$0xff]  ;;  %v1039_v39 = vpack.c.bf16 %v208_v29, %v206_v28 }
  0x69   :  { %1032 = vmatpush1.bf16.msra.mxu0 %v1031_v15  ;;  %1098 = vmatprep.subr.bf16.mxu1 %v1097_v21  ;;  %v573_v37 = vld [vmem:[%s2278_s3 + $0x88] sm:$0xff]  ;;  %v575_v38 = vld [vmem:[%s2278_s3 + $0x98] sm:$0xff]  ;;  %v210_v40 = vld [vmem:[%s2276_s1 + $0x580] sm:$0xff]  ;;  %v1103_v42 = vpack.c.bf16 %v570_v35, %v568_v34  ;;  %v1041_v43 = vpack.c.bf16 %v213_v36, %v211_v32 }
  0x6a   :  { %1034 = vmatprep.subr.bf16.mxu0 %v1033_v19  ;;  %v212_v41 = vld [vmem:[%s2276_s1 + $0x590] sm:$0xff]  ;;  %v215_v44 = vld [vmem:[%s2276_s1 + $0x5a8] sm:$0xff]  ;;  %v1105_v45 = vpack.c.bf16 %v575_v38, %v573_v37  ;;  %v572_v46 = vld [vmem:[%s2278_s3 + $0x80] sm:$0xff] }
  0x6b   :  { %v574_v47 = vld [vmem:[%s2278_s3 + $0x90] sm:$0xff]  ;;  %v217_v48 = vld [vmem:[%s2276_s1 + $0x5b8] sm:$0xff]  ;;  %v577_v49 = vld [vmem:[%s2278_s3 + $0xa8] sm:$0xff]  ;;  %v1043_v51 = vpack.c.bf16 %v212_v41, %v210_v40 }
  0x6c   :  { %1100 = vmatpush1.bf16.msra.mxu1 %v1099_v30  ;;  %v579_v50 = vld [vmem:[%s2278_s3 + $0xb8] sm:$0xff]  ;;  %v214_v52 = vld [vmem:[%s2276_s1 + $0x5a0] sm:$0xff]  ;;  %v216_v53 = vld [vmem:[%s2276_s1 + $0x5b0] sm:$0xff]  ;;  %v1107_v54 = vpack.c.bf16 %v574_v47, %v572_v46  ;;  %v1045_v55 = vpack.c.bf16 %v217_v48, %v215_v44 }
  0x6d   :  { %1036 = vmatpush1.bf16.msra.mxu0 %v1035_v27  ;;  %1102 = vmatprep.subr.bf16.mxu1 %v1101_v33  ;;  %v219_v56 = vld [vmem:[%s2276_s1 + $0x5c8] sm:$0xff]  ;;  %v1109_v57 = vpack.c.bf16 %v579_v50, %v577_v49  ;;  %v576_v58 = vld [vmem:[%s2278_s3 + $0xa0] sm:$0xff]  ;;  %v578_v59 = vld [vmem:[%s2278_s3 + $0xb0] sm:$0xff]  ;;  %v1047_v63 = vpack.c.bf16 %v216_v53, %v214_v52  ;;  %v1219_v49 = vmov 0.0  }
  0x6e   :  { %1038 = vmatprep.subr.bf16.mxu0 %v1037_v31  ;;  %v221_v60 = vld [vmem:[%s2276_s1 + $0x5d8] sm:$0xff]  ;;  %v581_v61 = vld [vmem:[%s2278_s3 + $0xc8] sm:$0xff]  ;;  %v218_v0 = vld [vmem:[%s2276_s1 + $0x5c0] sm:$0xff]  ;;  %v1111_v2 = vpack.c.bf16 %v578_v59, %v576_v58 }
  0x6f   :  { %v583_v62 = vld [vmem:[%s2278_s3 + $0xd8] sm:$0xff]  ;;  %v220_v1 = vld [vmem:[%s2276_s1 + $0x5d0] sm:$0xff]  ;;  %v1049_v3 = vpack.c.bf16 %v221_v60, %v219_v56  ;;  %v223_v4 = vld [vmem:[%s2276_s1 + $0x5e8] sm:$0xff] }
  0x70   :  { %1104 = vmatpush1.bf16.msra.mxu1 %v1103_v42  ;;  %v1113_v5 = vpack.c.bf16 %v583_v62, %v581_v61  ;;  %v580_v6 = vld [vmem:[%s2278_s3 + $0xc0] sm:$0xff]  ;;  %v582_v7 = vld [vmem:[%s2278_s3 + $0xd0] sm:$0xff]  ;;  %v225_v8 = vld [vmem:[%s2276_s1 + $0x5f8] sm:$0xff]  ;;  %v1051_v11 = vpack.c.bf16 %v220_v1, %v218_v0 }
  0x71   :  { %1040 = vmatpush1.bf16.msra.mxu0 %v1039_v39  ;;  %1106 = vmatprep.subr.bf16.mxu1 %v1105_v45  ;;  %v585_v9 = vld [vmem:[%s2278_s3 + $0xe8] sm:$0xff]  ;;  %v587_v10 = vld [vmem:[%s2278_s3 + $0xf8] sm:$0xff]  ;;  %v222_v12 = vld [vmem:[%s2276_s1 + $0x5e0] sm:$0xff]  ;;  %v1115_v14 = vpack.c.bf16 %v582_v7, %v580_v6  ;;  %v1053_v15 = vpack.c.bf16 %v225_v8, %v223_v4 }
  0x72   :  { %1042 = vmatprep.subr.bf16.mxu0 %v1041_v43  ;;  %v224_v13 = vld [vmem:[%s2276_s1 + $0x5f0] sm:$0xff]  ;;  %v227_v16 = vld [vmem:[%s2276_s1 + $0x608] sm:$0xff]  ;;  %v1117_v17 = vpack.c.bf16 %v587_v10, %v585_v9  ;;  %v584_v18 = vld [vmem:[%s2278_s3 + $0xe0] sm:$0xff] }
  0x73   :  { %v586_v19 = vld [vmem:[%s2278_s3 + $0xf0] sm:$0xff]  ;;  %v229_v20 = vld [vmem:[%s2276_s1 + $0x618] sm:$0xff]  ;;  %v589_v21 = vld [vmem:[%s2278_s3 + $0x108] sm:$0xff]  ;;  %v1055_v23 = vpack.c.bf16 %v224_v13, %v222_v12 }
  0x74   :  { %1108 = vmatpush1.bf16.msra.mxu1 %v1107_v54  ;;  %v591_v22 = vld [vmem:[%s2278_s3 + $0x118] sm:$0xff]  ;;  %v1119_v24 = vpack.c.bf16 %v586_v19, %v584_v18  ;;  %v1057_v25 = vpack.c.bf16 %v229_v20, %v227_v16  ;;  %v226_v26 = vld [vmem:[%s2276_s1 + $0x600] sm:$0xff]  ;;  %v228_v27 = vld [vmem:[%s2276_s1 + $0x610] sm:$0xff] }
  0x75   :  { %1044 = vmatpush1.bf16.msra.mxu0 %v1043_v51  ;;  %1110 = vmatprep.subr.bf16.mxu1 %v1109_v57  ;;  %v231_v28 = vld [vmem:[%s2276_s1 + $0x628] sm:$0xff]  ;;  %v1121_v29 = vpack.c.bf16 %v591_v22, %v589_v21  ;;  %v233_v30 = vld [vmem:[%s2276_s1 + $0x638] sm:$0xff]  ;;  %v588_v31 = vld [vmem:[%s2278_s3 + $0x100] sm:$0xff]  ;;  %v1059_v36 = vpack.c.bf16 %v228_v27, %v226_v26 }
  0x76   :  { %1046 = vmatprep.subr.bf16.mxu0 %v1045_v55  ;;  %v590_v32 = vld [vmem:[%s2278_s3 + $0x110] sm:$0xff]  ;;  %v593_v33 = vld [vmem:[%s2278_s3 + $0x128] sm:$0xff]  ;;  %v595_v34 = vld [vmem:[%s2278_s3 + $0x138] sm:$0xff]  ;;  %v1061_v37 = vpack.c.bf16 %v233_v30, %v231_v28 }
  0x77   :  { %v31_v35 = vld [vmem:[%s2275_s0 + $0x20] sm:$0xff]  ;;  %v232_v39 = vld [vmem:[%s2276_s1 + $0x630] sm:$0xff]  ;;  %v235_v40 = vld [vmem:[%s2276_s1 + $0x648] sm:$0xff]  ;;  %v1123_v41 = vpack.c.bf16 %v590_v32, %v588_v31  ;;  %v1125_v43 = vpack.c.bf16 %v595_v34, %v593_v33 }
  0x78   :  { %1112 = vmatpush1.bf16.msra.mxu1 %v1111_v2  ;;  %v230_v38 = vld [vmem:[%s2276_s1 + $0x620] sm:$0xff]  ;;  %v237_v42 = vld [vmem:[%s2276_s1 + $0x658] sm:$0xff]  ;;  %v594_v45 = vld [vmem:[%s2278_s3 + $0x130] sm:$0xff] }
  0x79   :  { %1048 = vmatpush1.bf16.msra.mxu0 %v1047_v63  ;;  %1114 = vmatprep.subr.bf16.mxu1 %v1113_v5  ;;  %v592_v44 = vld [vmem:[%s2278_s3 + $0x120] sm:$0xff]  ;;  %v597_v46 = vld [vmem:[%s2278_s3 + $0x148] sm:$0xff]  ;;  %v599_v47 = vld [vmem:[%s2278_s3 + $0x158] sm:$0xff]  ;;  %v1063_v48 = vpack.c.bf16 %v232_v39, %v230_v38  ;;  %v1065_v50 = vpack.c.bf16 %v237_v42, %v235_v40 }
  0x7a   :  { %1050 = vmatprep.subr.bf16.mxu0 %v1049_v3  ;;  %v234_v51 = vld [vmem:[%s2276_s1 + $0x640] sm:$0xff]  ;;  %v236_v52 = vld [vmem:[%s2276_s1 + $0x650] sm:$0xff]  ;;  %v239_v53 = vld [vmem:[%s2276_s1 + $0x668] sm:$0xff]  ;;  %v1127_v54 = vpack.c.bf16 %v594_v45, %v592_v44  ;;  %v1129_v56 = vpack.c.bf16 %v599_v47, %v597_v46 }
  0x7b   :  { %v241_v55 = vld [vmem:[%s2276_s1 + $0x678] sm:$0xff]  ;;  %v596_v57 = vld [vmem:[%s2278_s3 + $0x140] sm:$0xff]  ;;  %v598_v58 = vld [vmem:[%s2278_s3 + $0x150] sm:$0xff]  ;;  %v1067_v61 = vpack.c.bf16 %v236_v52, %v234_v51 }
  0x7c   :  { %1116 = vmatpush1.bf16.msra.mxu1 %v1115_v14  ;;  %v601_v59 = vld [vmem:[%s2278_s3 + $0x168] sm:$0xff]  ;;  %v603_v60 = vld [vmem:[%s2278_s3 + $0x178] sm:$0xff]  ;;  %v1069_v62 = vpack.c.bf16 %v241_v55, %v239_v53  ;;  %v238_v63 = vld [vmem:[%s2276_s1 + $0x660] sm:$0xff]  ;;  %v1131_v2 = vpack.c.bf16 %v598_v58, %v596_v57 }
  0x7d   :  { %1052 = vmatpush1.bf16.msra.mxu0 %v1051_v11  ;;  %1118 = vmatprep.subr.bf16.mxu1 %v1117_v17  ;;  %v240_v0 = vld [vmem:[%s2276_s1 + $0x670] sm:$0xff]  ;;  %v243_v1 = vld [vmem:[%s2276_s1 + $0x688] sm:$0xff]  ;;  %v245_v3 = vld [vmem:[%s2276_s1 + $0x698] sm:$0xff]  ;;  %v1133_v4 = vpack.c.bf16 %v603_v60, %v601_v59 }
  0x7e   :  { %1054 = vmatprep.subr.bf16.mxu0 %v1053_v15  ;;  %v600_v5 = vld [vmem:[%s2278_s3 + $0x160] sm:$0xff]  ;;  %v602_v6 = vld [vmem:[%s2278_s3 + $0x170] sm:$0xff]  ;;  %v605_v7 = vld [vmem:[%s2278_s3 + $0x188] sm:$0xff]  ;;  %v1071_v9 = vpack.c.bf16 %v240_v0, %v238_v63  ;;  %v1073_v10 = vpack.c.bf16 %v245_v3, %v243_v1 }
  0x7f   :  { %v607_v8 = vld [vmem:[%s2278_s3 + $0x198] sm:$0xff]  ;;  %v242_v11 = vld [vmem:[%s2276_s1 + $0x680] sm:$0xff]  ;;  %v244_v12 = vld [vmem:[%s2276_s1 + $0x690] sm:$0xff]  ;;  %v1135_v14 = vpack.c.bf16 %v602_v6, %v600_v5 }
  0x80   :  { %1120 = vmatpush1.bf16.msra.mxu1 %v1119_v24  ;;  %v247_v13 = vld [vmem:[%s2276_s1 + $0x6a8] sm:$0xff]  ;;  %v249_v15 = vld [vmem:[%s2276_s1 + $0x6b8] sm:$0xff]  ;;  %v1137_v16 = vpack.c.bf16 %v607_v8, %v605_v7  ;;  %v604_v17 = vld [vmem:[%s2278_s3 + $0x180] sm:$0xff]  ;;  %v1075_v21 = vpack.c.bf16 %v244_v12, %v242_v11 }
  0x81   :  { %1056 = vmatpush1.bf16.msra.mxu0 %v1055_v23  ;;  %1122 = vmatprep.subr.bf16.mxu1 %v1121_v29  ;;  %v606_v18 = vld [vmem:[%s2278_s3 + $0x190] sm:$0xff]  ;;  %v609_v19 = vld [vmem:[%s2278_s3 + $0x1a8] sm:$0xff]  ;;  %v611_v20 = vld [vmem:[%s2278_s3 + $0x1b8] sm:$0xff]  ;;  %v1077_v22 = vpack.c.bf16 %v249_v15, %v247_v13 }
  0x82   :  { %1058 = vmatprep.subr.bf16.mxu0 %v1057_v25  ;;  %v246_v23 = vld [vmem:[%s2276_s1 + $0x6a0] sm:$0xff]  ;;  %v248_v24 = vld [vmem:[%s2276_s1 + $0x6b0] sm:$0xff]  ;;  %v251_v25 = vld [vmem:[%s2276_s1 + $0x6c8] sm:$0xff]  ;;  %v1139_v26 = vpack.c.bf16 %v606_v18, %v604_v17  ;;  %v1141_v28 = vpack.c.bf16 %v611_v20, %v609_v19 }
  0x83   :  { %v253_v27 = vld [vmem:[%s2276_s1 + $0x6d8] sm:$0xff]  ;;  %v608_v29 = vld [vmem:[%s2278_s3 + $0x1a0] sm:$0xff]  ;;  %v610_v30 = vld [vmem:[%s2278_s3 + $0x1b0] sm:$0xff]  ;;  %v1079_v31 = vpack.c.bf16 %v248_v24, %v246_v23 }
  0x84   :  { %477 = vmatmul.mubr.f32.vlgmr.msra.gmra.mrb[0].mxu0 %v31_v35  ;;  %1124 = vmatpush1.bf16.msra.mxu1 %v1123_v41  ;;  %v1081_v32 = vpack.c.bf16 %v253_v27, %v251_v25  ;;  %v250_v33 = vld [vmem:[%s2276_s1 + $0x6c0] sm:$0xff]  ;;  %v252_v34 = vld [vmem:[%s2276_s1 + $0x6d0] sm:$0xff]  ;;  %v1143_v35 = vpack.c.bf16 %v610_v30, %v608_v29  ;;  %v613_v44 = vld [vmem:[%s2278_s3 + $0x1c8] sm:$0xff] }
  0x85   :  { %1060 = vmatpush1.bf16.msra.mxu0 %v1059_v36  ;;  %547 = vmatprep.mubr.f32.mxu0 %v1219_v49  ;;  %v255_v36 = vld [vmem:[%s2276_s1 + $0x6e8] sm:$0xff]  ;;  %v1083_v38 = vpack.c.bf16 %v252_v34, %v250_v33  ;;  %v254_v40 = vld [vmem:[%s2276_s1 + $0x6e0] sm:$0xff]  ;;  %v256_v41 = vld [vmem:[%s2276_s1 + $0x6f0] sm:$0xff] }
  0x86   :  { %1062 = vmatprep.subr.bf16.mxu0 %v1061_v37  ;;  %1126 = vmatprep.subr.bf16.mxu1 %v1125_v43  ;;  %v257_v37 = vld [vmem:[%s2276_s1 + $0x6f8] sm:$0xff]  ;;  %v1087_v42 = vpack.c.bf16 %v256_v41, %v254_v40  ;;  %v33_v43 = vld [vmem:[%s2275_s0 + $0x30] sm:$0xff]  ;;  %v612_v47 = vld [vmem:[%s2278_s3 + $0x1c0] sm:$0xff] }
  0x87   :  { %v1085_v39 = vpack.c.bf16 %v257_v37, %v255_v36  ;;  %v615_v45 = vld [vmem:[%s2278_s3 + $0x1d8] sm:$0xff]  ;;  %v616_v53 = vld [vmem:[%s2278_s3 + $0x1e0] sm:$0xff]  ;;  %v722_v57 = vld [vmem:[%s2280_s5 + $0x88] sm:$0xff] }
  0x88   :  { %1128 = vmatpush1.bf16.msra.mxu1 %v1127_v54  ;;  %v1145_v46 = vpack.c.bf16 %v615_v45, %v613_v44  ;;  %v619_v51 = vld [vmem:[%s2278_s3 + $0x1f8] sm:$0xff]  ;;  %v618_v54 = vld [vmem:[%s2278_s3 + $0x1f0] sm:$0xff]  ;;  %v258_v0 = vld [vmem:[%s2277_s2] sm:$0x3] }
  0x89   :  { %1064 = vmatpush1.bf16.msra.mxu0 %v1063_v48  ;;  %1130 = vmatprep.subr.bf16.mxu1 %v1129_v56  ;;  %v614_v48 = vld [vmem:[%s2278_s3 + $0x1d0] sm:$0xff]  ;;  %v1151_v55 = vpack.c.bf16 %v618_v54, %v616_v53  ;;  %v721_v56 = vld [vmem:[%s2280_s5 + $0x80] sm:$0xff]  ;;  %v724_v13 = vld [vmem:[%s2280_s5 + $0x98] sm:$0xff] }
  0x8a   :  { %1066 = vmatprep.subr.bf16.mxu0 %v1065_v50  ;;  %v1147_v49 = vpack.c.bf16 %v614_v48, %v612_v47  ;;  %v617_v50 = vld [vmem:[%s2278_s3 + $0x1e8] sm:$0xff]  ;;  %v1153_v58 = vpack.c.bf16 %v722_v57, %v721_v56  ;;  %v723_v12 = vld [vmem:[%s2280_s5 + $0x90] sm:$0xff]  ;;  %v708_v19 = vld [vmem:[%s2280_s5 + $0x18] sm:$0xff] }
  0x8b   :  { %v1149_v52 = vpack.c.bf16 %v619_v51, %v617_v50  ;;  %v1157_v17 = vpack.c.bf16 %v724_v13, %v723_v12  ;;  %v707_v18 = vld [vmem:[%s2280_s5 + $0x10] sm:$0xff]  ;;  %v725_v20 = vld [vmem:[%s2280_s5 + $0xa0] sm:$0xff]  ;;  %v710_v25 = vld [vmem:[%s2280_s5 + $0x28] sm:$0xff] }
  0x8c   :  { %1132 = vmatpush1.bf16.msra.mxu1 %v1131_v2  ;;  %v709_v24 = vld [vmem:[%s2280_s5 + $0x20] sm:$0xff]  ;;  %v728_v27 = vld [vmem:[%s2280_s5 + $0xb8] sm:$0xff]  ;;  %v711_v30 = vld [vmem:[%s2280_s5 + $0x30] sm:$0xff] }
  0x8d   :  { %1068 = vmatpush1.bf16.msra.mxu0 %v1067_v61  ;;  %1134 = vmatprep.subr.bf16.mxu1 %v1133_v4  ;;  %v260_v61 = vlaneseq  ;;  %v730_v33 = vld [vmem:[%s2280_s5 + $0xc8] sm:$0xff]  ;;  %v713_v36 = vld [vmem:[%s2280_s5 + $0x40] sm:$0xff]  ;;  %v735_v51 = vld [vmem:[%s2280_s5 + $0xf0] sm:$0xff] }
  0x8e   :  { %1070 = vmatprep.subr.bf16.mxu0 %v1069_v62  ;;  %v714_v37 = vld [vmem:[%s2280_s5 + $0x48] sm:$0xff]  ;;  %v733_v44 = vld [vmem:[%s2280_s5 + $0xe0] sm:$0xff]  ;;  %v719_v54 = vld [vmem:[%s2280_s5 + $0x70] sm:$0xff] }
  0x8f   :  { %v2152_v62 = vshrl.u32 %v260_v61, 7  ;;  %v1171_v40 = vpack.c.bf16 %v714_v37, %v713_v36  ;;  %v734_v45 = vld [vmem:[%s2280_s5 + $0xe8] sm:$0xff]  ;;  %v717_v48 = vld [vmem:[%s2280_s5 + $0x60] sm:$0xff] }
  0x90   :  { %1136 = vmatpush1.bf16.msra.mxu1 %v1135_v14  ;;  %v1177_v47 = vpack.c.bf16 %v734_v45, %v733_v44  ;;  %v620_v57 = vld [vmem:[%s2279_s4] sm:$0x3]  ;;  %s1220_s4 = smov [#allocation2]  }
  0x91   :  { %1072 = vmatpush1.bf16.msra.mxu0 %v1071_v9  ;;  %1138 = vmatprep.subr.bf16.mxu1 %v1137_v16  ;;  %v262_v63 = vsub.s32 0, %v2152_v62  ;;  %v266_v1 = vsub.s32 1, %v2152_v62  ;;  %v705_v9 = vld [vmem:[%s2280_s5] sm:$0xff]  ;;  %s821_s1 = sshll.u32 %s1220_s4, 4  ;;  %s822_s1 = int_to_ptr.vmem [resolvable:$true] %s821_s1 }
  0x92   :  { %1074 = vmatprep.subr.bf16.mxu0 %v1073_v10  ;;  %v706_v10 = vld [vmem:[%s2280_s5 + $0x8] sm:$0xff]  ;;  %s1195_s27 = scalar_lea.vmem %s822_s1, 128  ;;  %p1200_p1 = scmp.lt.s32.totalorder %s822_s1, %s822_s1 }
  0x93   :  { %v263_v2 = vrot.slane %v258_v0, %v262_v63  ;;  %v267_v3 = vrot.slane %v258_v0, %v266_v1  ;;  %v1155_v15 = vpack.c.bf16 %v706_v10, %v705_v9  ;;  %p1196_p0 = scmp.ne.s32.totalorder %s822_s1, %s1195_s27  ;;  %p1201_p2 = scmp.lt.s32.totalorder %s1195_s27, %s1195_s27 }
  0x94   :  { %1140 = vmatpush1.bf16.msra.mxu1 %v1139_v26  ;;  %v727_v26 = vld [vmem:[%s2280_s5 + $0xb0] sm:$0xff] }
  0x95   :  { %1076 = vmatpush1.bf16.msra.mxu0 %v1075_v21  ;;  %1142 = vmatprep.subr.bf16.mxu1 %v1141_v28  ;;  %v726_v21 = vld [vmem:[%s2280_s5 + $0xa8] sm:$0xff]  ;;  %v1163_v28 = vpack.c.bf16 %v710_v25, %v709_v24  ;;  %v1165_v29 = vpack.c.bf16 %v728_v27, %v727_v26  ;;  %p1202_p3 = por %p1201_p2, %p1200_p1 }
  0x96   :  { %1078 = vmatprep.subr.bf16.mxu0 %v1077_v22  ;;  %v1159_v22 = vpack.c.bf16 %v708_v19, %v707_v18  ;;  %v1161_v23 = vpack.c.bf16 %v726_v21, %v725_v20 }
  0x97   :  { %p1203_p4 = pnand %p1202_p3, %p1196_p0 }
  0x98   :  { %1144 = vmatpush1.bf16.msra.mxu1 %v1143_v35 }
  0x99   :  { %1080 = vmatpush1.bf16.msra.mxu0 %v1079_v31  ;;  %1146 = vmatprep.subr.bf16.mxu1 %v1145_v46  ;;  %v712_v31 = vld [vmem:[%s2280_s5 + $0x38] sm:$0xff] }
  0x9a   :  { %1082 = vmatprep.subr.bf16.mxu0 %v1081_v32  ;;  %v729_v32 = vld [vmem:[%s2280_s5 + $0xc0] sm:$0xff]  ;;  %v1167_v34 = vpack.c.bf16 %v712_v31, %v711_v30 }
  0x9b   :  { %v1169_v35 = vpack.c.bf16 %v730_v33, %v729_v32 }
  0x9c   :  { %1148 = vmatpush1.bf16.msra.mxu1 %v1147_v49  ;;  %v718_v49 = vld [vmem:[%s2280_s5 + $0x68] sm:$0xff] }
  0x9d   :  { %1084 = vmatpush1.bf16.msra.mxu0 %v1083_v38  ;;  %1150 = vmatprep.subr.bf16.mxu1 %v1149_v52  ;;  %v731_v38 = vld [vmem:[%s2280_s5 + $0xd0] sm:$0xff]  ;;  %v1179_v50 = vpack.c.bf16 %v718_v49, %v717_v48  ;;  %v736_v52 = vld [vmem:[%s2280_s5 + $0xf8] sm:$0xff] }
  0x9e   :  { %1086 = vmatprep.subr.bf16.mxu0 %v1085_v39  ;;  %v732_v39 = vld [vmem:[%s2280_s5 + $0xd8] sm:$0xff]  ;;  %v1181_v53 = vpack.c.bf16 %v736_v52, %v735_v51 }
  0x9f   :  { %v1173_v41 = vpack.c.bf16 %v732_v39, %v731_v38 }
  0xa0   :  { %1152 = vmatpush1.bf16.msra.mxu1 %v1151_v55  ;;  %v720_v55 = vld [vmem:[%s2280_s5 + $0x78] sm:$0xff] }
  0xa1   :  { %1088 = vmatpush1.bf16.msra.mxu0 %v1087_v42  ;;  %1154 = vmatprep.subr.bf16.mxu1 %v1153_v58  ;;  %v715_v42 = vld [vmem:[%s2280_s5 + $0x50] sm:$0xff]  ;;  %v1183_v56 = vpack.c.bf16 %v720_v55, %v719_v54  ;;  %v625_v58 = vrot.slane %v620_v57, %v262_v63 }
  0xa4   :  { %548 = vmatmul.mubr.f32.vlgmr.msra.gmra.mrb[0].mxu0 %v33_v43  ;;  %v716_v43 = vld [vmem:[%s2280_s5 + $0x58] sm:$0xff] }
  0xa5   :  { %v1175_v46 = vpack.c.bf16 %v716_v43, %v715_v42 }
 0x136   :  { %v336_v59 = vpop.f32.mrb[0].mxu1 }
 0x137   :  { %v338_v60 = vpop.f32.mrb[1].mxu1  ;;  %v337_v4 = vadd.f32 %v336_v59, %v263_v2  ;;  %v629_v59 = vrot.slane %v620_v57, %v266_v1 }
 0x138   :  { %v339_v5 = vadd.f32 %v338_v60, %v267_v3 }
 0x177   :  { %v549_v6 = vpop.f32.mrb[0].mxu0 }
 0x178   :  { %v1186_v7 = vadd.f32 %v549_v6, %v337_v4  ;;  %v551_v8 = vpop.f32.mrb[1].mxu0 }
 0x179   :  { %v1188_v11 = vadd.f32 %v551_v8, %v339_v5 }
 0x17a   :  { %v554_v16 = vmax.f32 %v1186_v7, 0.0  ;;  %v829_v7 = vld [vmem:[%s2281_s6] ss:$0 sm:$0xff] }
 0x17b   :  { %v555_v14 = vmax.f32 %v1188_v11, 0.0 }
 0x17d   :  { %696 = vmatprep.mubr.f32.mxu1 %v555_v14 }
 0x17e   :  { %697 = vmatmul.mubr.f32.vlgmr.msra.gmra.mrb[2].mxu1 %v554_v16 }
 0x17f   :  { %1156 = vmatpush3.bf16.msra.mxu1 %v1155_v15 }
 0x180   :  { %1158 = vmatprep.subr.bf16.mxu1 %v1157_v17 }
 0x183   :  { %1160 = vmatpush3.bf16.msra.mxu1 %v1159_v22 }
 0x184   :  { %1162 = vmatprep.subr.bf16.mxu1 %v1161_v23 }
 0x187   :  { %1164 = vmatpush3.bf16.msra.mxu1 %v1163_v28 }
 0x188   :  { %1166 = vmatprep.subr.bf16.mxu1 %v1165_v29 }
 0x18b   :  { %1168 = vmatpush3.bf16.msra.mxu1 %v1167_v34 }
 0x18c   :  { %1170 = vmatprep.subr.bf16.mxu1 %v1169_v35 }
 0x18f   :  { %1172 = vmatpush3.bf16.msra.mxu1 %v1171_v40 }
 0x190   :  { %1174 = vmatprep.subr.bf16.mxu1 %v1173_v41 }
 0x193   :  { %1176 = vmatpush3.bf16.msra.mxu1 %v1175_v46 }
 0x194   :  { %1178 = vmatprep.subr.bf16.mxu1 %v1177_v47 }
 0x197   :  { %1180 = vmatpush3.bf16.msra.mxu1 %v1179_v50 }
 0x198   :  { %1182 = vmatprep.subr.bf16.mxu1 %v1181_v53 }
 0x19b   :  { %1184 = vmatpush3.bf16.msra.mxu1 %v1183_v56 }
 0x251   :  { %v698_v60 = vpop.f32.mrb[2].mxu1 }
 0x252   :  { %v699_v61 = vadd.f32 %v698_v60, %v625_v58  ;;  %v700_v0 = vpop.f32.mrb[3].mxu1 }
 0x253   :  { %v701_v2 = vadd.f32 %v700_v0, %v629_v59 }
 0x254   :  { %v703_v4 = vmax.f32 %v699_v61, 0.0 }
 0x255   :  { %v704_v3 = vmax.f32 %v701_v2, 0.0 }
 0x257   :  { %808 = vmatprep.mubr.f32.mxu1 %v704_v3 }
 0x258   :  { %809 = vmatmul.mubr.f32.vlgmr.msra.gmra.mrb[4].mxu1 %v703_v4 }
 0x32b   :  { %v862_v5 = vpop.f32.mrb[4].mxu1 }
 0x32c   :  { %v863_v6 = vpop.f32.mrb[5].mxu1 }
 0x32d   :  { %v864_v63 = vadd.f32 %v863_v6, %v862_v5 }
 0x32f   :  { %v811_v8 = vadd.f32 %v864_v63, %v829_v7 }
 0x331   :  { %814 = vst [vmem:[#allocation2] sm:$0xff] %v811_v8 }
 0x332   :  { %1206 = shalt.err (!%p1203_p4)
}
 0x333   :  { %s1207_s0 = scalar_lea.hbm %s2282_s7, 128 }
 0x334   :  { %p1208_p5 = scmp.ne.s32.totalorder %s2282_s7, %s1207_s0  ;;  %p1211_p6 = scmp.lt.u32.totalorder %s1207_s0, %s2282_s7 }
 0x336   :  { %p1213_p7 = pnand %p1211_p6, %p1208_p5 }
 0x338   :  { %1216 = shalt.err (!%p1213_p7)
}
 0x339   :  { %824 = dma.vmem_to_hbm [thread:$0]  %s822_s1, 128, %s2282_s7, [#allocation3]  }
 0x33a   :  { %1217 = dma.done.wait [#allocation3], 128  }
 0x33b   :  { %1218 = vsyncadd [#allocation3], 4294967168 }
 0x33c   :  { %828 = vsyncpa [#allocation3], 1 }

</bundles_post_ra>
